<compile_context>
chip_gen: v5e
topology: v5e:2x2
jax: 0.10.0
libtpu: 0.0.40
codegen_flags: <defaults>
</compile_context>

<pallas_src>
import math
import functools

import jax
import jax.numpy as jnp
from jax.experimental import pallas as pl
from jax.experimental.pallas import tpu as pltpu

_LANES = 128
_SQRT2 = math.sqrt(2.0)
_Y00 = 0.28209479177387814  # 1 / (2 * sqrt(pi))


def _double_factorial(n: int) -> int:
    out = 1
    while n > 1:
        out *= n
        n -= 2
    return out


def _sh_kernel(dirs_ref, out_ref, *, degree: int, chunk_sublanes: int):
    """dirs_ref: (3, sub, 128) x/y/z planes; out_ref: (degree**2, sub, 128).

    Points live on the (sublane, lane) axes.  Work is done per sublane chunk
    (8 or 16 rows) so the live vreg set stays small regardless of how large
    the DMA tile (sub) is.  Coefficients are stored as soon as they are
    produced (m-outer / l-inner).
    """
    dt = out_ref.dtype
    sub = dirs_ref.shape[1]
    cs = chunk_sublanes
    n_chunks = sub // cs

    @pl.loop(0, n_chunks)
    def _(c):
        r0 = pl.multiple_of(c * cs, cs)
        rows = pl.ds(r0, cs)
        x = dirs_ref[0, rows, :]
        y = dirs_ref[1, rows, :]
        z = dirs_ref[2, rows, :]

        # l = 0 band is a constant.
        out_ref[0, rows, :] = jnp.full(x.shape, _Y00, dtype=dt)

        A = None  # sin^m(theta) * cos(m*phi);  m == 0 -> 1 (implicit)
        B = None  # sin^m(theta) * sin(m*phi);  m == 0 -> 0 (implicit)
        for m in range(degree):
            if m == 1:
                A, B = x, y
            elif m > 1:
                A, B = x * A - y * B, x * B + y * A

            # Q_{l,m} = P_l^m(z) / sin^m(theta): polynomial in z via the
            # standard two-term recurrence at fixed m.  All scalar factors
            # fold at trace time (no runtime divides).
            q_mm = float((-1.0) ** m * _double_factorial(2 * m - 1))
            q_prev2 = None
            q_prev1 = None
            for l in range(m, degree):
                if l == m:
                    q = q_mm                                   # trace-time const
                elif l == m + 1:
                    q = ((2 * m + 1) * q_mm) * z
                else:
                    c1 = (2 * l - 1) / (l - m)
                    c2 = (l + m - 1) / (l - m)
                    q = (c1 * z) * q_prev1 - c2 * q_prev2
                q_prev2, q_prev1 = q_prev1, q

                base = l * l + l
                K = math.sqrt((2 * l + 1) / (4.0 * math.pi)
                              * math.factorial(l - m) / math.factorial(l + m))
                if m == 0:
                    if l > 0:                                  # l == 0 stored above
                        out_ref[base, rows, :] = (K * q).astype(dt)
                else:
                    cq = (_SQRT2 * K) * q                      # folds when q const
                    out_ref[base + m, rows, :] = (cq * A).astype(dt)   # m > 0
                    out_ref[base - m, rows, :] = (cq * B).astype(dt)   # m < 0


def spherical_encoding(p, degree: int = 10, tile: int = 8192,
                       out_dtype=jnp.float32, feature_major: bool = False,
                       min_grid_steps: int = 4):
    """(N, 3) [or (3, N)] unit directions -> (N, degree**2) SH basis.

    feature_major=True returns the kernel-native (degree**2, N) layout without
    the final transpose — preferred when the features feed a matmul/MLP, since
    the compatibility transpose costs an extra HBM round trip on the output
    slab.  out_dtype=jnp.bfloat16 halves HBM writeback (recurrences stay f32);
    use it when the consumer accepts bf16 features.
    """
    assert degree >= 1
    assert p.ndim == 2, "expected (N, 3) or (3, N) directions"

    # Accept feature-major (3, N) input directly (skips the (N,3)->(3,N) pass).
    if p.shape[0] == 3 and p.shape[1] != 3:
        dirs_fm = p.astype(jnp.float32)                 # (3, N)
    else:
        assert p.shape[1] == 3, "expected (N, 3) or (3, N) directions"
        dirs_fm = p.astype(jnp.float32).T               # (3, N)

    n = dirs_fm.shape[1]
    d2 = degree * degree

    # Pick the points-per-step tile: as large as requested (8192 default,
    # ~6.8 MiB double-buffered VMEM at degree=10 f32 — fits v5e/v6e/v7x default
    # scoped limits), but shrink so we get >= min_grid_steps even "parallel"
    # steps whenever the input allows (keeps both v7x TensorCores busy and the
    # pipeline warm).  Tile stays a multiple of 1024 = 8 sublanes * 128 lanes.
    group = 8 * _LANES
    assert tile % group == 0, "tile must be a multiple of 1024"
    groups_total = pl.cdiv(n, group)
    groups_per_step = tile // group
    if groups_total >= min_grid_steps:
        groups_per_step = min(groups_per_step, max(1, groups_total // min_grid_steps))
    else:
        groups_per_step = 1
    tile = groups_per_step * group
    sub = tile // _LANES                                # sublanes per grid step
    n_pad = pl.cdiv(n, tile) * tile

    if n_pad != n:
        # Padded points are x=y=z=0: finite garbage rows, sliced off below.
        dirs_fm = jnp.pad(dirs_fm, ((0, 0), (0, n_pad - n)))
    dirs = dirs_fm.reshape(3, n_pad // _LANES, _LANES)

    # Inner compute chunk: 16 sublanes when possible (2 f32 vregs per value,
    # ~14 live vregs), else 8 — keeps Mosaic regalloc spill-free so the only
    # stores competing for the vst slot are the d2 output stores.
    chunk_sublanes = 16 if sub % 16 == 0 else 8

    out3 = pl.pallas_call(
        functools.partial(_sh_kernel, degree=degree, chunk_sublanes=chunk_sublanes),
        out_shape=jax.ShapeDtypeStruct((d2, n_pad // _LANES, _LANES), out_dtype),
        grid=(n_pad // tile,),
        in_specs=[pl.BlockSpec((3, sub, _LANES), lambda i: (0, i, 0))],
        out_specs=pl.BlockSpec((d2, sub, _LANES), lambda i: (0, i, 0)),
        compiler_params=pltpu.CompilerParams(
            dimension_semantics=("parallel",)),
    )(dirs)

    out_fm = out3.reshape(d2, n_pad)[:, :n]
    if feature_major:
        return out_fm          # (degree**2, N): no transpose, fuse downstream
    # Compatibility path (matches the PyTorch module's (N, degree**2) layout).
    # NOTE: this transpose is an extra HBM round trip on the output slab;
    # prefer feature_major=True (or fuse the transpose into the consumer)
    # in production pipelines.
    return out_fm.T


class SphericalEncoding:
    """JAX/Pallas port of helixsurf.models.embedder.SphericalEncoding (forward only)."""

    def __init__(self, degree: int = 10) -> None:
        self.degree = degree

    def __call__(self, p, feature_major: bool = False):
        return spherical_encoding(p, degree=self.degree,
                                  feature_major=feature_major)

    def __repr__(self) -> str:
        return f"SphericalEncoding(degree={self.degree})"

    # TODO(synk): custom backward (_C.spherical_harmonic_backward) not implemented;
    # forward-only kernel.


if __name__ == "__main__":
    key = jax.random.PRNGKey(0)
    n = 512
    raw = jax.random.normal(key, (n, 3), dtype=jnp.float32)
    dirs = raw / jnp.linalg.norm(raw, axis=-1, keepdims=True)

    degree = 4
    enc = SphericalEncoding(degree=degree)
    out = jax.block_until_ready(enc(dirs))
    assert out.shape == (n, degree * degree), out.shape

    x, y, z = dirs[:, 0], dirs[:, 1], dirs[:, 2]
    # Reference values: tiny-cuda-nn / instant-ngp hard-coded real-SH polynomials.
    checks = {
        0: jnp.full((n,), 0.28209479177387814, dtype=jnp.float32),
        1: -0.48860251190291987 * y,
        2: 0.48860251190291987 * z,
        3: -0.48860251190291987 * x,
        4: 1.0925484305920792 * x * y,
        5: -1.0925484305920792 * y * z,
        6: 0.94617469575755997 * z * z - 0.31539156525251999,
        8: 0.54627421529603959 * (x * x - y * y),
        9: 0.59004358992664352 * y * (-3.0 * x * x + y * y),
        12: 0.3731763325901154 * z * (5.0 * z * z - 3.0),
    }
    for idx, ref in checks.items():
        assert jnp.allclose(out[:, idx], ref, atol=1e-5), f"mismatch at SH index {idx}"

    # Fused-layout fast path (no output transpose) agrees with the compat layout.
    out_fm = jax.block_until_ready(enc(dirs, feature_major=True))
    assert out_fm.shape == (degree * degree, n)
    assert jnp.allclose(out_fm.T, out, atol=1e-6)

    # Feature-major (3, N) input path agrees too.
    out_t = jax.block_until_ready(spherical_encoding(dirs.T, degree=degree))
    assert jnp.allclose(out_t, out, atol=1e-6)

    # bf16-output writeback-halving path (quantized, looser tolerance).
    out_bf = jax.block_until_ready(
        spherical_encoding(dirs, degree=degree, out_dtype=jnp.bfloat16))
    assert out_bf.dtype == jnp.bfloat16
    assert jnp.allclose(out_bf.astype(jnp.float32), out, atol=2e-2)

    # Default module degree (10): shape + finiteness sanity check.
    out10 = jax.block_until_ready(SphericalEncoding(degree=10)(dirs))
    assert out10.shape == (n, 100)
    assert bool(jnp.all(jnp.isfinite(out10)))
    assert jnp.allclose(out10[:, 2], 0.48860251190291987 * z, atol=1e-5)

    print("KERNEL_OK")
</pallas_src>

<mosaic_0001>
module attributes {stable_mosaic.version = 11 : i64} {
  func.func @_sh_kernel(%arg0: i32, %arg1: memref<3x8x128xf32, #tpu.memory_space<vmem>>, %arg2: memref<16x8x128xf32, #tpu.memory_space<vmem>>) attributes {dimension_semantics = [#tpu.dimension_semantics<parallel>], iteration_bounds = array<i64: 1>, scalar_prefetch = 0 : i64, scratch_operands = 0 : i64, tpu.core_type = #tpu.core_type<tc>, window_params = [{transform_indices = @transform_0, window_bounds = array<i64: 3, 8, 128>}, {transform_indices = @transform_1, window_bounds = array<i64: 16, 8, 128>}]} {
    %c0_i32 = arith.constant 0 : i32
    %c1_i32 = arith.constant 1 : i32
    %0 = arith.muli %c0_i32, %c1_i32 : i32
    %c0_i32_0 = arith.constant 0 : i32
    %1 = arith.addi %c0_i32_0, %0 : i32
    %c8_i32 = arith.constant 8 : i32
    %2 = arith.muli %1, %c8_i32 : i32
    %3 = tpu.assume_multiple %2, 8 : i32
    %c0 = arith.constant 0 : index
    %4 = arith.index_cast %3 : i32 to index
    %c0_1 = arith.constant 0 : index
    %5 = vector.load %arg1[%c0, %4, %c0_1] : memref<3x8x128xf32, #tpu.memory_space<vmem>>, vector<1x8x128xf32>
    %6 = vector.shape_cast %5 : vector<1x8x128xf32> to vector<8x128xf32>
    %c1 = arith.constant 1 : index
    %7 = arith.index_cast %3 : i32 to index
    %c0_2 = arith.constant 0 : index
    %8 = vector.load %arg1[%c1, %7, %c0_2] : memref<3x8x128xf32, #tpu.memory_space<vmem>>, vector<1x8x128xf32>
    %9 = vector.shape_cast %8 : vector<1x8x128xf32> to vector<8x128xf32>
    %c2 = arith.constant 2 : index
    %10 = arith.index_cast %3 : i32 to index
    %c0_3 = arith.constant 0 : index
    %11 = vector.load %arg1[%c2, %10, %c0_3] : memref<3x8x128xf32, #tpu.memory_space<vmem>>, vector<1x8x128xf32>
    %12 = vector.shape_cast %11 : vector<1x8x128xf32> to vector<8x128xf32>
    %cst = arith.constant 0.282094806 : f32
    %13 = vector.broadcast %cst : f32 to vector<8x128xf32>
    %c0_4 = arith.constant 0 : index
    %14 = arith.index_cast %3 : i32 to index
    %c0_5 = arith.constant 0 : index
    %15 = vector.load %arg2[%c0_4, %14, %c0_5] : memref<16x8x128xf32, #tpu.memory_space<vmem>>, vector<1x8x128xf32>
    %16 = vector.shape_cast %15 : vector<1x8x128xf32> to vector<8x128xf32>
    %17 = vector.shape_cast %13 : vector<8x128xf32> to vector<1x8x128xf32>
    tpu.vector_store %arg2[%c0_4, %14, %c0_5], %17 {strides = array<i32>} : memref<16x8x128xf32, #tpu.memory_space<vmem>>, vector<1x8x128xf32>,
    %cst_6 = arith.constant 1.000000e+00 : f32
    %18 = vector.broadcast %cst_6 : f32 to vector<8x128xf32>
    %19 = arith.mulf %18, %12 : vector<8x128xf32>
    %cst_7 = arith.constant 0.488602519 : f32
    %20 = vector.broadcast %cst_7 : f32 to vector<8x128xf32>
    %21 = arith.mulf %20, %19 : vector<8x128xf32>
    %c2_8 = arith.constant 2 : index
    %22 = arith.index_cast %3 : i32 to index
    %c0_9 = arith.constant 0 : index
    %23 = vector.load %arg2[%c2_8, %22, %c0_9] : memref<16x8x128xf32, #tpu.memory_space<vmem>>, vector<1x8x128xf32>
    %24 = vector.shape_cast %23 : vector<1x8x128xf32> to vector<8x128xf32>
    %25 = vector.shape_cast %21 : vector<8x128xf32> to vector<1x8x128xf32>
    tpu.vector_store %arg2[%c2_8, %22, %c0_9], %25 {strides = array<i32>} : memref<16x8x128xf32, #tpu.memory_space<vmem>>, vector<1x8x128xf32>,
    %cst_10 = arith.constant 1.500000e+00 : f32
    %26 = vector.broadcast %cst_10 : f32 to vector<8x128xf32>
    %27 = arith.mulf %26, %12 : vector<8x128xf32>
    %28 = arith.mulf %27, %19 : vector<8x128xf32>
    %cst_11 = arith.constant 5.000000e-01 : f32
    %29 = vector.broadcast %cst_11 : f32 to vector<8x128xf32>
    %30 = arith.subf %28, %29 : vector<8x128xf32>
    %cst_12 = arith.constant 0.63078314 : f32
    %31 = vector.broadcast %cst_12 : f32 to vector<8x128xf32>
    %32 = arith.mulf %31, %30 : vector<8x128xf32>
    %c6 = arith.constant 6 : index
    %33 = arith.index_cast %3 : i32 to index
    %c0_13 = arith.constant 0 : index
    %34 = vector.load %arg2[%c6, %33, %c0_13] : memref<16x8x128xf32, #tpu.memory_space<vmem>>, vector<1x8x128xf32>
    %35 = vector.shape_cast %34 : vector<1x8x128xf32> to vector<8x128xf32>
    %36 = vector.shape_cast %32 : vector<8x128xf32> to vector<1x8x128xf32>
    tpu.vector_store %arg2[%c6, %33, %c0_13], %36 {strides = array<i32>} : memref<16x8x128xf32, #tpu.memory_space<vmem>>, vector<1x8x128xf32>,
    %cst_14 = arith.constant 1.66666663 : f32
    %37 = vector.broadcast %cst_14 : f32 to vector<8x128xf32>
    %38 = arith.mulf %37, %12 : vector<8x128xf32>
    %39 = arith.mulf %38, %30 : vector<8x128xf32>
    %cst_15 = arith.constant 0.666666686 : f32
    %40 = vector.broadcast %cst_15 : f32 to vector<8x128xf32>
    %41 = arith.mulf %40, %19 : vector<8x128xf32>
    %42 = arith.subf %39, %41 : vector<8x128xf32>
    %cst_16 = arith.constant 0.746352672 : f32
    %43 = vector.broadcast %cst_16 : f32 to vector<8x128xf32>
    %44 = arith.mulf %43, %42 : vector<8x128xf32>
    %c12 = arith.constant 12 : index
    %45 = arith.index_cast %3 : i32 to index
    %c0_17 = arith.constant 0 : index
    %46 = vector.load %arg2[%c12, %45, %c0_17] : memref<16x8x128xf32, #tpu.memory_space<vmem>>, vector<1x8x128xf32>
    %47 = vector.shape_cast %46 : vector<1x8x128xf32> to vector<8x128xf32>
    %48 = vector.shape_cast %44 : vector<8x128xf32> to vector<1x8x128xf32>
    tpu.vector_store %arg2[%c12, %45, %c0_17], %48 {strides = array<i32>} : memref<16x8x128xf32, #tpu.memory_space<vmem>>, vector<1x8x128xf32>,
    %cst_18 = arith.constant -0.488602519 : f32
    %49 = vector.broadcast %cst_18 : f32 to vector<8x128xf32>
    %50 = arith.mulf %49, %6 : vector<8x128xf32>
    %c3 = arith.constant 3 : index
    %51 = arith.index_cast %3 : i32 to index
    %c0_19 = arith.constant 0 : index
    %52 = vector.load %arg2[%c3, %51, %c0_19] : memref<16x8x128xf32, #tpu.memory_space<vmem>>, vector<1x8x128xf32>
    %53 = vector.shape_cast %52 : vector<1x8x128xf32> to vector<8x128xf32>
    %54 = vector.shape_cast %50 : vector<8x128xf32> to vector<1x8x128xf32>
    tpu.vector_store %arg2[%c3, %51, %c0_19], %54 {strides = array<i32>} : memref<16x8x128xf32, #tpu.memory_space<vmem>>, vector<1x8x128xf32>,
    %cst_20 = arith.constant -0.488602519 : f32
    %55 = vector.broadcast %cst_20 : f32 to vector<8x128xf32>
    %56 = arith.mulf %55, %9 : vector<8x128xf32>
    %c1_21 = arith.constant 1 : index
    %57 = arith.index_cast %3 : i32 to index
    %c0_22 = arith.constant 0 : index
    %58 = vector.load %arg2[%c1_21, %57, %c0_22] : memref<16x8x128xf32, #tpu.memory_space<vmem>>, vector<1x8x128xf32>
    %59 = vector.shape_cast %58 : vector<1x8x128xf32> to vector<8x128xf32>
    %60 = vector.shape_cast %56 : vector<8x128xf32> to vector<1x8x128xf32>
    tpu.vector_store %arg2[%c1_21, %57, %c0_22], %60 {strides = array<i32>} : memref<16x8x128xf32, #tpu.memory_space<vmem>>, vector<1x8x128xf32>,
    %cst_23 = arith.constant -3.000000e+00 : f32
    %61 = vector.broadcast %cst_23 : f32 to vector<8x128xf32>
    %62 = arith.mulf %61, %12 : vector<8x128xf32>
    %cst_24 = arith.constant 0.3641828 : f32
    %63 = vector.broadcast %cst_24 : f32 to vector<8x128xf32>
    %64 = arith.mulf %63, %62 : vector<8x128xf32>
    %65 = arith.mulf %64, %6 : vector<8x128xf32>
    %c7 = arith.constant 7 : index
    %66 = arith.index_cast %3 : i32 to index
    %c0_25 = arith.constant 0 : index
    %67 = vector.load %arg2[%c7, %66, %c0_25] : memref<16x8x128xf32, #tpu.memory_space<vmem>>, vector<1x8x128xf32>
    %68 = vector.shape_cast %67 : vector<1x8x128xf32> to vector<8x128xf32>
    %69 = vector.shape_cast %65 : vector<8x128xf32> to vector<1x8x128xf32>
    tpu.vector_store %arg2[%c7, %66, %c0_25], %69 {strides = array<i32>} : memref<16x8x128xf32, #tpu.memory_space<vmem>>, vector<1x8x128xf32>,
    %70 = arith.mulf %64, %9 : vector<8x128xf32>
    %c5 = arith.constant 5 : index
    %71 = arith.index_cast %3 : i32 to index
    %c0_26 = arith.constant 0 : index
    %72 = vector.load %arg2[%c5, %71, %c0_26] : memref<16x8x128xf32, #tpu.memory_space<vmem>>, vector<1x8x128xf32>
    %73 = vector.shape_cast %72 : vector<1x8x128xf32> to vector<8x128xf32>
    %74 = vector.shape_cast %70 : vector<8x128xf32> to vector<1x8x128xf32>
    tpu.vector_store %arg2[%c5, %71, %c0_26], %74 {strides = array<i32>} : memref<16x8x128xf32, #tpu.memory_space<vmem>>, vector<1x8x128xf32>,
    %cst_27 = arith.constant 2.500000e+00 : f32
    %75 = vector.broadcast %cst_27 : f32 to vector<8x128xf32>
    %76 = arith.mulf %75, %12 : vector<8x128xf32>
    %77 = arith.mulf %76, %62 : vector<8x128xf32>
    %cst_28 = arith.constant -1.500000e+00 : f32
    %78 = vector.broadcast %cst_28 : f32 to vector<8x128xf32>
    %79 = arith.subf %77, %78 : vector<8x128xf32>
    %cst_29 = arith.constant 0.304697186 : f32
    %80 = vector.broadcast %cst_29 : f32 to vector<8x128xf32>
    %81 = arith.mulf %80, %79 : vector<8x128xf32>
    %82 = arith.mulf %81, %6 : vector<8x128xf32>
    %c13 = arith.constant 13 : index
    %83 = arith.index_cast %3 : i32 to index
    %c0_30 = arith.constant 0 : index
    %84 = vector.load %arg2[%c13, %83, %c0_30] : memref<16x8x128xf32, #tpu.memory_space<vmem>>, vector<1x8x128xf32>
    %85 = vector.shape_cast %84 : vector<1x8x128xf32> to vector<8x128xf32>
    %86 = vector.shape_cast %82 : vector<8x128xf32> to vector<1x8x128xf32>
    tpu.vector_store %arg2[%c13, %83, %c0_30], %86 {strides = array<i32>} : memref<16x8x128xf32, #tpu.memory_space<vmem>>, vector<1x8x128xf32>,
    %87 = arith.mulf %81, %9 : vector<8x128xf32>
    %c11 = arith.constant 11 : index
    %88 = arith.index_cast %3 : i32 to index
    %c0_31 = arith.constant 0 : index
    %89 = vector.load %arg2[%c11, %88, %c0_31] : memref<16x8x128xf32, #tpu.memory_space<vmem>>, vector<1x8x128xf32>
    %90 = vector.shape_cast %89 : vector<1x8x128xf32> to vector<8x128xf32>
    %91 = vector.shape_cast %87 : vector<8x128xf32> to vector<1x8x128xf32>
    tpu.vector_store %arg2[%c11, %88, %c0_31], %91 {strides = array<i32>} : memref<16x8x128xf32, #tpu.memory_space<vmem>>, vector<1x8x128xf32>,
    %92 = arith.mulf %6, %6 : vector<8x128xf32>
    %93 = arith.mulf %9, %9 : vector<8x128xf32>
    %94 = arith.subf %92, %93 : vector<8x128xf32>
    %95 = arith.mulf %6, %9 : vector<8x128xf32>
    %96 = arith.mulf %9, %6 : vector<8x128xf32>
    %97 = arith.addf %95, %96 : vector<8x128xf32>
    %cst_32 = arith.constant 0.546274245 : f32
    %98 = vector.broadcast %cst_32 : f32 to vector<8x128xf32>
    %99 = arith.mulf %98, %94 : vector<8x128xf32>
    %c8 = arith.constant 8 : index
    %100 = arith.index_cast %3 : i32 to index
    %c0_33 = arith.constant 0 : index
    %101 = vector.load %arg2[%c8, %100, %c0_33] : memref<16x8x128xf32, #tpu.memory_space<vmem>>, vector<1x8x128xf32>
    %102 = vector.shape_cast %101 : vector<1x8x128xf32> to vector<8x128xf32>
    %103 = vector.shape_cast %99 : vector<8x128xf32> to vector<1x8x128xf32>
    tpu.vector_store %arg2[%c8, %100, %c0_33], %103 {strides = array<i32>} : memref<16x8x128xf32, #tpu.memory_space<vmem>>, vector<1x8x128xf32>,
    %cst_34 = arith.constant 0.546274245 : f32
    %104 = vector.broadcast %cst_34 : f32 to vector<8x128xf32>
    %105 = arith.mulf %104, %97 : vector<8x128xf32>
    %c4 = arith.constant 4 : index
    %106 = arith.index_cast %3 : i32 to index
    %c0_35 = arith.constant 0 : index
    %107 = vector.load %arg2[%c4, %106, %c0_35] : memref<16x8x128xf32, #tpu.memory_space<vmem>>, vector<1x8x128xf32>
    %108 = vector.shape_cast %107 : vector<1x8x128xf32> to vector<8x128xf32>
    %109 = vector.shape_cast %105 : vector<8x128xf32> to vector<1x8x128xf32>
    tpu.vector_store %arg2[%c4, %106, %c0_35], %109 {strides = array<i32>} : memref<16x8x128xf32, #tpu.memory_space<vmem>>, vector<1x8x128xf32>,
    %cst_36 = arith.constant 1.500000e+01 : f32
    %110 = vector.broadcast %cst_36 : f32 to vector<8x128xf32>
    %111 = arith.mulf %110, %12 : vector<8x128xf32>
    %cst_37 = arith.constant 0.0963537171 : f32
    %112 = vector.broadcast %cst_37 : f32 to vector<8x128xf32>
    %113 = arith.mulf %112, %111 : vector<8x128xf32>
    %114 = arith.mulf %113, %94 : vector<8x128xf32>
    %c14 = arith.constant 14 : index
    %115 = arith.index_cast %3 : i32 to index
    %c0_38 = arith.constant 0 : index
    %116 = vector.load %arg2[%c14, %115, %c0_38] : memref<16x8x128xf32, #tpu.memory_space<vmem>>, vector<1x8x128xf32>
    %117 = vector.shape_cast %116 : vector<1x8x128xf32> to vector<8x128xf32>
    %118 = vector.shape_cast %114 : vector<8x128xf32> to vector<1x8x128xf32>
    tpu.vector_store %arg2[%c14, %115, %c0_38], %118 {strides = array<i32>} : memref<16x8x128xf32, #tpu.memory_space<vmem>>, vector<1x8x128xf32>,
    %119 = arith.mulf %113, %97 : vector<8x128xf32>
    %c10 = arith.constant 10 : index
    %120 = arith.index_cast %3 : i32 to index
    %c0_39 = arith.constant 0 : index
    %121 = vector.load %arg2[%c10, %120, %c0_39] : memref<16x8x128xf32, #tpu.memory_space<vmem>>, vector<1x8x128xf32>
    %122 = vector.shape_cast %121 : vector<1x8x128xf32> to vector<8x128xf32>
    %123 = vector.shape_cast %119 : vector<8x128xf32> to vector<1x8x128xf32>
    tpu.vector_store %arg2[%c10, %120, %c0_39], %123 {strides = array<i32>} : memref<16x8x128xf32, #tpu.memory_space<vmem>>, vector<1x8x128xf32>,
    %124 = arith.mulf %6, %94 : vector<8x128xf32>
    %125 = arith.mulf %9, %97 : vector<8x128xf32>
    %126 = arith.subf %124, %125 : vector<8x128xf32>
    %127 = arith.mulf %6, %97 : vector<8x128xf32>
    %128 = arith.mulf %9, %94 : vector<8x128xf32>
    %129 = arith.addf %127, %128 : vector<8x128xf32>
    %cst_40 = arith.constant -0.590043604 : f32
    %130 = vector.broadcast %cst_40 : f32 to vector<8x128xf32>
    %131 = arith.mulf %130, %126 : vector<8x128xf32>
    %c15 = arith.constant 15 : index
    %132 = arith.index_cast %3 : i32 to index
    %c0_41 = arith.constant 0 : index
    %133 = vector.load %arg2[%c15, %132, %c0_41] : memref<16x8x128xf32, #tpu.memory_space<vmem>>, vector<1x8x128xf32>
    %134 = vector.shape_cast %133 : vector<1x8x128xf32> to vector<8x128xf32>
    %135 = vector.shape_cast %131 : vector<8x128xf32> to vector<1x8x128xf32>
    tpu.vector_store %arg2[%c15, %132, %c0_41], %135 {strides = array<i32>} : memref<16x8x128xf32, #tpu.memory_space<vmem>>, vector<1x8x128xf32>,
    %cst_42 = arith.constant -0.590043604 : f32
    %136 = vector.broadcast %cst_42 : f32 to vector<8x128xf32>
    %137 = arith.mulf %136, %129 : vector<8x128xf32>
    %c9 = arith.constant 9 : index
    %138 = arith.index_cast %3 : i32 to index
    %c0_43 = arith.constant 0 : index
    %139 = vector.load %arg2[%c9, %138, %c0_43] : memref<16x8x128xf32, #tpu.memory_space<vmem>>, vector<1x8x128xf32>
    %140 = vector.shape_cast %139 : vector<1x8x128xf32> to vector<8x128xf32>
    %141 = vector.shape_cast %137 : vector<8x128xf32> to vector<1x8x128xf32>
    tpu.vector_store %arg2[%c9, %138, %c0_43], %141 {strides = array<i32>} : memref<16x8x128xf32, #tpu.memory_space<vmem>>, vector<1x8x128xf32>,
    %c1_i32_44 = arith.constant 1 : i32
    return
  }
  func.func @transform_0(%arg0: i32) -> (i32, i32, i32) {
    %c0_i32 = arith.constant 0 : i32
    %c0_i32_0 = arith.constant 0 : i32
    %c0_i32_1 = arith.constant 0 : i32
    return %c0_i32, %arg0, %c0_i32_0 : i32, i32, i32
  }
  func.func @transform_1(%arg0: i32) -> (i32, i32, i32) {
    %c0_i32 = arith.constant 0 : i32
    %c0_i32_0 = arith.constant 0 : i32
    %c0_i32_1 = arith.constant 0 : i32
    return %c0_i32, %arg0, %c0_i32_0 : i32, i32, i32
  }
}

</mosaic_0001>

<bundles_post_ra>
// kernel: tpu_custom_call.1
= control target key start
LH: loop header
LB: loop body
LE: loop exit
PB: predicated region body
PF: predicated region fallthrough
CT: control target
= control target key end

     0   :  { %6 = vsyncpa [#allocation3], 0  ;;  %s239_s0 = inlined_call_operand.hbm [shape: f32[3,8,128], index: 0, kind: input, shape index: {}]   ;;  %s240_s1 = inlined_call_operand.hbm [shape: f32[16,8,128], index: 1, kind: output, shape index: {}]  }
   0x1   :  { %7 = vsyncpa [#allocation4], 0  ;;  %s12_s8 = sshll.u32 %s239_s0, 4  ;;  %s212_s9 = smov [#allocation2]   ;;  %s13_s8 = int_to_ptr.hbm [resolvable:$true] %s12_s8 }
   0x2   :  { %s14_s10 = sshll.u32 %s212_s9, 4  ;;  %s213_s11 = smov 128   ;;  %s15_s10 = int_to_ptr.vmem [resolvable:$true] %s14_s10 }
   0x3   :  { %s214_s12 = smov 8  }
   0x4   :  { %20 = dma.hbm_to_vmem [thread:$0]  %s13_s8, 384, %s15_s10, [#allocation3], %s213_s11, %s213_s11, %s214_s12  }
   0x5   :  { %208 = dma.done.wait [#allocation3], 384  }
   0x6   :  { %209 = vsyncadd [#allocation3], 4294966912  ;;  %v215_v0 = vmov 0.2820948   ;;  %v31_v1 = vld [vmem:[#allocation2 + $0x10] sm:$0xff]  ;;  %v25_v2 = vld [vmem:[#allocation2] sm:$0xff] }
   0x7   :  { %32 = vst [vmem:[#allocation5] sm:$0xff] %v215_v0  ;;  %v28_v3 = vld [vmem:[#allocation2 + $0x8] sm:$0xff]  ;;  %v33_v4 = vmul.f32 0.48860252, %v31_v1  ;;  %v36_v5 = vmul.f32 1.5, %v31_v1  ;;  %v58_v6 = vmul.f32 -3.0, %v31_v1  ;;  %v80_v10 = vmul.f32 %v25_v2, %v25_v2 }
   0x8   :  { %v43_v7 = vmul.f32 1.6666666, %v31_v1  ;;  %v51_v8 = vmul.f32 -0.48860252, %v25_v2  ;;  %v55_v9 = vmul.f32 -0.48860252, %v28_v3  ;;  %v81_v14 = vmul.f32 %v28_v3, %v28_v3 }
   0x9   :  { %35 = vst [vmem:[#allocation5 + $0x10] sm:$0xff] %v33_v4  ;;  %v37_v11 = vmul.f32 %v36_v5, %v31_v1  ;;  %v59_v12 = vmul.f32 0.3641828, %v58_v6  ;;  %v68_v13 = vmul.f32 2.5, %v31_v1  ;;  %v45_v15 = vmul.f32 0.6666667, %v31_v1 }
   0xa   :  { %54 = vst [vmem:[#allocation5 + $0x18] sm:$0xff] %v51_v8  ;;  %v83_v16 = vmul.f32 %v28_v3, %v25_v2  ;;  %v93_v17 = vmul.f32 15.0, %v31_v1  ;;  %v82_v22 = vsub.f32 %v80_v10, %v81_v14  ;;  %s216_s0 = smov [#allocation5]   ;;  %s123_s16 = sshll.u32 %s240_s1, 4  ;;  %s124_s16 = int_to_ptr.hbm [resolvable:$true] %s123_s16 }
   0xb   :  { %v153_v18 = vadd.f32 -0.5, %v37_v11  ;;  %57 = vst [vmem:[#allocation5 + $0x8] sm:$0xff] %v55_v9  ;;  %v60_v19 = vmul.f32 %v59_v12, %v25_v2  ;;  %v64_v20 = vmul.f32 %v59_v12, %v28_v3  ;;  %v69_v21 = vmul.f32 %v68_v13, %v58_v6  ;;  %s121_s13 = sshll.u32 %s216_s0, 4  ;;  %s122_s13 = int_to_ptr.vmem [resolvable:$true] %s121_s13 }
   0xc   :  { %v84_v23 = vadd.f32 %v83_v16, %v83_v16  ;;  %v94_v24 = vmul.f32 0.09635372, %v93_v17  ;;  %v85_v28 = vmul.f32 0.54627424, %v82_v22  ;;  %v103_v33 = vmul.f32 %v82_v22, %v25_v2 }
   0xd   :  { %v39_v25 = vmul.f32 0.63078314, %v153_v18  ;;  %v44_v26 = vmul.f32 %v153_v18, %v43_v7  ;;  %63 = vst [vmem:[#allocation5 + $0x38] sm:$0xff] %v60_v19  ;;  %v154_v27 = vadd.f32 1.5, %v69_v21  ;;  %v107_v36 = vmul.f32 %v82_v22, %v28_v3 }
   0xe   :  { %67 = vst [vmem:[#allocation5 + $0x28] sm:$0xff] %v64_v20  ;;  %v89_v29 = vmul.f32 0.54627424, %v84_v23  ;;  %v95_v30 = vmul.f32 %v94_v24, %v82_v22  ;;  %v104_v34 = vmul.f32 %v84_v23, %v28_v3  ;;  %v106_v35 = vmul.f32 %v84_v23, %v25_v2 }
   0xf   :  { %42 = vst [vmem:[#allocation5 + $0x30] sm:$0xff] %v39_v25  ;;  %v46_v31 = vsub.f32 %v44_v26, %v45_v15  ;;  %v71_v32 = vmul.f32 0.3046972, %v154_v27  ;;  %v99_v41 = vmul.f32 %v94_v24, %v84_v23 }
  0x10   :  { %88 = vst [vmem:[#allocation5 + $0x40] sm:$0xff] %v85_v28  ;;  %v105_v40 = vsub.f32 %v103_v33, %v104_v34  ;;  %v108_v42 = vadd.f32 %v107_v36, %v106_v35 }
  0x11   :  { %v47_v37 = vmul.f32 0.7463527, %v46_v31  ;;  %v72_v38 = vmul.f32 %v71_v32, %v25_v2  ;;  %v76_v39 = vmul.f32 %v71_v32, %v28_v3  ;;  %92 = vst [vmem:[#allocation5 + $0x20] sm:$0xff] %v89_v29 }
  0x12   :  { %98 = vst [vmem:[#allocation5 + $0x70] sm:$0xff] %v95_v30  ;;  %v109_v43 = vmul.f32 -0.5900436, %v105_v40  ;;  %v113_v44 = vmul.f32 -0.5900436, %v108_v42 }
  0x13   :  { %50 = vst [vmem:[#allocation5 + $0x60] sm:$0xff] %v47_v37 }
  0x14   :  { %75 = vst [vmem:[#allocation5 + $0x68] sm:$0xff] %v72_v38 }
  0x15   :  { %79 = vst [vmem:[#allocation5 + $0x58] sm:$0xff] %v76_v39 }
  0x16   :  { %102 = vst [vmem:[#allocation5 + $0x50] sm:$0xff] %v99_v41 }
  0x17   :  { %112 = vst [vmem:[#allocation5 + $0x78] sm:$0xff] %v109_v43 }
  0x18   :  { %116 = vst [vmem:[#allocation5 + $0x48] sm:$0xff] %v113_v44 }
  0x19   :  { %129 = dma.vmem_to_hbm [thread:$0]  %s122_s13, 2048, %s124_s16, [#allocation4], %s213_s11, %s213_s11, %s214_s12  }
  0x1a   :  { %210 = dma.done.wait [#allocation4], 2048  }
  0x1b   :  { %211 = vsyncadd [#allocation4], 4294965248 }
  0x1c   :  { %134 = vsyncpa [#allocation3], 1 }
  0x1d   :  { %135 = vsyncpa [#allocation4], 1 }

</bundles_post_ra>
